<compile_context>
chip_gen: v7x
topology: tpu7x:2x2x1
jax: 0.10.0
libtpu: 0.0.40
codegen_flags: <defaults>
</compile_context>

<pallas_src>
import functools

import jax
import jax.numpy as jnp
from jax import lax
from jax.experimental import pallas as pl
from jax.experimental.pallas import tpu as pltpu


# ---------------------------------------------------------------------------
# Fused kernel: qkv + adapter prefix + attention + output projection.
# grid = (B, num_q_tiles); k/v scratch persists across the (arbitrary) q axis.
# ---------------------------------------------------------------------------
def fused_adapter_attention_kernel(
        x_ref,                       # (1, N, C)  original dtype (e.g. f32)
        wq_ref, bq_ref,              # (C, C) bf16 / (1, C) f32   (attn scale folded)
        wk_ref, bk_ref,              # (C, C) bf16 / (1, C) f32   (p_scale*bup_k folded)
        wv_ref, bv_ref,              # (C, C) bf16 / (1, C) f32   (p_scale*bup_v folded)
        wdown_ref, bdown_ref,        # (C, mid) bf16 / (1, mid) f32
        wupk_ref, wupv_ref,          # (mid, C) bf16              (p_scale folded)
        wproj_ref, bproj_ref,        # (C, C) bf16 / (1, C) f32
        o_ref,                       # (1, TQ, C) output block
        k_scr, v_scr,                # (N, C) bf16 scratch, persists across q tiles
        acc_scr,                     # (TQ, C) f32 fused-projection accumulator
        *, num_heads, q_tile):
    qi = pl.program_id(1)
    dim = x_ref.shape[-1]
    head_dim = dim // num_heads

    # ---- k/v (+ adapter prefix) for the whole sequence, once per batch ----
    @pl.when(qi == 0)
    def _():
        xf = x_ref[0].astype(jnp.bfloat16)                               # (N, C)
        h = jnp.tanh(
            jnp.dot(xf, wdown_ref[...], preferred_element_type=jnp.float32)
            + bdown_ref[...]).astype(jnp.bfloat16)
        k = (jnp.dot(xf, wk_ref[...], preferred_element_type=jnp.float32)
             + jnp.dot(h, wupk_ref[...], preferred_element_type=jnp.float32)
             + bk_ref[...])
        v = (jnp.dot(xf, wv_ref[...], preferred_element_type=jnp.float32)
             + jnp.dot(h, wupv_ref[...], preferred_element_type=jnp.float32)
             + bv_ref[...])
        k_scr[...] = k.astype(k_scr.dtype)
        v_scr[...] = v.astype(v_scr.dtype)

    # ---- q rows for this tile (attention scale pre-folded into wq / bq) ----
    start = qi * q_tile
    if q_tile % 8 == 0:
        start = pl.multiple_of(start, 8)
    xt = x_ref[0, pl.ds(start, q_tile), :].astype(jnp.bfloat16)          # (TQ, C)
    q = (jnp.dot(xt, wq_ref[...], preferred_element_type=jnp.float32)
         + bq_ref[...]).astype(jnp.bfloat16)                             # (TQ, C)
    k = k_scr[...]
    v = v_scr[...]

    # ---- attention + fused output projection, one head's scores live at a time ----
    for hd in range(num_heads):
        sl = slice(hd * head_dim, (hd + 1) * head_dim)
        qh, kh, vh = q[:, sl], k[:, sl], v[:, sl]                        # (., Dh)
        # scores: contract last dims directly -> no materialized k.T
        s = lax.dot_general(qh, kh, (((1,), (1,)), ((), ())),
                            preferred_element_type=jnp.float32)          # (TQ, N)
        s = s - jnp.max(s, axis=-1, keepdims=True)
        p = jnp.exp(s)
        p = p * pl.reciprocal(jnp.sum(p, axis=-1, keepdims=True), approx=True)
        ctx = jnp.dot(p.astype(vh.dtype), vh,
                      preferred_element_type=jnp.float32)                # (TQ, Dh)
        # fused projection: ctx_h @ Wproj[h*Dh:(h+1)*Dh, :] accumulated full-width
        contrib = jnp.dot(ctx.astype(jnp.bfloat16), wproj_ref[sl, :],
                          preferred_element_type=jnp.float32)            # (TQ, C)
        if hd == 0:
            acc_scr[...] = contrib
        else:
            acc_scr[...] += contrib

    # single lane-dense store of the whole output tile
    o_ref[0] = (acc_scr[...] + bproj_ref[...]).astype(o_ref.dtype)


# ---------------------------------------------------------------------------
# Wrapper
# ---------------------------------------------------------------------------
def _q_tile_size(seq_len, max_tile=512):
    """q-dimension tile: full N when small, else the largest clean divisor."""
    if seq_len <= max_tile:
        return seq_len
    for t in (max_tile, 384, 256, 128, 64, 32, 16, 8):
        if seq_len % t == 0:
            return t
    # TODO(synk): ragged long sequences (N > max_tile, no 8-aligned divisor) fall
    # back to an untiled q dimension; pad N (with key masking) upstream if that
    # exceeds the VMEM budget.
    return seq_len


def _vmem_limit_bytes():
    try:
        cap = pltpu.get_tpu_info().vmem_capacity_bytes
    except Exception:
        cap = 64 * 1024 * 1024              # conservative (v7x-sized) fallback
    # ~75% of physical VMEM: ~96 MiB on v5e/v6e, ~48 MiB on v7x.
    return int(cap * 3 // 4)


def adapter_attention(x, kparams, *, num_heads, q_tile_max=512, out_dtype=None):
    B, N, C = x.shape
    mid = kparams["wdown"].shape[1]
    TQ = _q_tile_size(N, q_tile_max)
    num_q = pl.cdiv(N, TQ)
    out_dtype = x.dtype if out_dtype is None else out_dtype

    # Single-buffer the resident weights only when the (never re-DMA'd) second
    # buffer would eat a meaningful VMEM fraction (matters for C >= ~1024 on v7x).
    weight_bytes = 2 * (4 * C * C + 3 * C * mid)       # bf16 weights, single copy
    single_buffer = weight_bytes > (4 * 1024 * 1024)

    def const_spec(shape):
        idx = lambda b, qi: (0,) * len(shape)
        if single_buffer:
            try:
                return pl.BlockSpec(shape, idx, pipeline_mode=pl.Buffered(1))
            except TypeError:
                pass
        return pl.BlockSpec(shape, idx)

    kernel = functools.partial(fused_adapter_attention_kernel,
                               num_heads=num_heads, q_tile=TQ)

    out = pl.pallas_call(
        kernel,
        grid=(B, num_q),
        in_specs=[
            pl.BlockSpec((1, N, C), lambda b, qi: (b, 0, 0)),      # x (per batch)
            const_spec((C, C)), const_spec((1, C)),                # wq, bq
            const_spec((C, C)), const_spec((1, C)),                # wk, bk
            const_spec((C, C)), const_spec((1, C)),                # wv, bv
            const_spec((C, mid)), const_spec((1, mid)),            # wdown, bdown
            const_spec((mid, C)), const_spec((mid, C)),            # wupk, wupv
            const_spec((C, C)), const_spec((1, C)),                # wproj, bproj
        ],
        out_specs=pl.BlockSpec((1, TQ, C), lambda b, qi: (b, qi, 0)),
        out_shape=jax.ShapeDtypeStruct((B, N, C), out_dtype),
        scratch_shapes=[
            pltpu.VMEM((N, C), jnp.bfloat16),     # k (+prefix), per batch
            pltpu.VMEM((N, C), jnp.bfloat16),     # v (+prefix), per batch
            pltpu.VMEM((TQ, C), jnp.float32),     # fused projection accumulator
        ],
        compiler_params=pltpu.CompilerParams(
            dimension_semantics=("parallel", "arbitrary"),
            vmem_limit_bytes=_vmem_limit_bytes(),
        ),
    )(x,
      kparams["wq"], kparams["bq"], kparams["wk"], kparams["bk"],
      kparams["wv"], kparams["bv"], kparams["wdown"], kparams["bdown"],
      kparams["wupk"], kparams["wupv"], kparams["wproj"], kparams["bproj"])

    return out


# ---------------------------------------------------------------------------
# Parameters (PyTorch-equivalent, weights pre-transposed to (in, out)) and the
# kernel-side prepared params (scale/p_scale folding, q/k/v splitting, bf16 cast).
# ---------------------------------------------------------------------------
def init_params(key, dim, mid_dim):
    ks = jax.random.split(key, 8)
    s = 0.02
    return dict(
        wqkv=s * jax.random.normal(ks[0], (dim, 3 * dim), jnp.float32),
        bqkv=s * jax.random.normal(ks[1], (1, 3 * dim), jnp.float32),
        wdown=s * jax.random.normal(ks[2], (dim, mid_dim), jnp.float32),
        bdown=s * jax.random.normal(ks[3], (1, mid_dim), jnp.float32),
        wup=s * jax.random.normal(ks[4], (mid_dim, 2 * dim), jnp.float32),
        bup=s * jax.random.normal(ks[5], (1, 2 * dim), jnp.float32),
        wproj=s * jax.random.normal(ks[6], (dim, dim), jnp.float32),
        bproj=s * jax.random.normal(ks[7], (1, dim), jnp.float32),
    )


def prepare_kernel_params(params, *, num_heads, p_scale, compute_dtype=jnp.bfloat16):
    C = params["wqkv"].shape[0]
    scale = (C // num_heads) ** -0.5
    wqkv, bqkv = params["wqkv"], params["bqkv"]
    wup, bup = params["wup"], params["bup"]
    f32 = jnp.float32
    return dict(
        # attention scale folded into the q projection (adapter q-prefix is zero)
        wq=(scale * wqkv[:, :C]).astype(compute_dtype),
        bq=(scale * bqkv[:, :C]).astype(f32),
        wk=wqkv[:, C:2 * C].astype(compute_dtype),
        bk=(bqkv[:, C:2 * C] + p_scale * bup[:, :C]).astype(f32),
        wv=wqkv[:, 2 * C:].astype(compute_dtype),
        bv=(bqkv[:, 2 * C:] + p_scale * bup[:, C:]).astype(f32),
        wdown=params["wdown"].astype(compute_dtype),
        bdown=params["bdown"].astype(f32),
        # p_scale folded into the adapter up-projection weights
        wupk=(p_scale * wup[:, :C]).astype(compute_dtype),
        wupv=(p_scale * wup[:, C:]).astype(compute_dtype),
        wproj=params["wproj"].astype(compute_dtype),
        bproj=params["bproj"].astype(f32),
    )


# ---------------------------------------------------------------------------
# Pure-JAX f32 reference (mirrors the PyTorch forward exactly, eval mode)
# ---------------------------------------------------------------------------
def adapter_attention_ref(x, params, *, num_heads, p_scale):
    B, N, C = x.shape
    Dh = C // num_heads
    scale = Dh ** -0.5
    base = x @ params["wqkv"] + params["bqkv"]
    h = jnp.tanh(x @ params["wdown"] + params["bdown"])
    kv = h @ params["wup"] + params["bup"]
    prefix = jnp.concatenate([jnp.zeros((B, N, C), x.dtype), kv], axis=-1)
    qkv = (base + p_scale * prefix).reshape(B, N, 3, num_heads, Dh).transpose(2, 0, 3, 1, 4)
    q, k, v = qkv[0], qkv[1], qkv[2]
    attn = jax.nn.softmax((q @ jnp.swapaxes(k, -2, -1)) * scale, axis=-1)
    ctx = (attn @ v).transpose(0, 2, 1, 3).reshape(B, N, C)
    return ctx @ params["wproj"] + params["bproj"]


if __name__ == "__main__":
    B, N, C = 2, 8, 32
    num_heads = 4
    mid_dim = 16
    p_scale = 0.8

    key = jax.random.PRNGKey(0)
    kx, kp = jax.random.split(key)
    x = jax.random.normal(kx, (B, N, C), jnp.float32)
    params = init_params(kp, C, mid_dim)
    kparams = prepare_kernel_params(params, num_heads=num_heads, p_scale=p_scale)

    out = adapter_attention(x, kparams, num_heads=num_heads)
    out = jax.block_until_ready(out)

    ref = adapter_attention_ref(x, params, num_heads=num_heads, p_scale=p_scale)
    assert out.shape == (B, N, C)
    # bf16 matmul inputs + approx reciprocal -> small drift vs the f32 reference
    assert jnp.allclose(out, ref, atol=2e-2, rtol=2e-2), (
        "mismatch vs reference: max abs diff = "
        f"{float(jnp.max(jnp.abs(out - ref)))}")

    print("KERNEL_OK")
</pallas_src>

<mosaic_0001>
module attributes {stable_mosaic.version = 11 : i64} {
  func.func @fused_adapter_attention_kernel(%arg0: i32, %arg1: i32, %arg2: memref<1x8x32xf32, #tpu.memory_space<vmem>>, %arg3: memref<32x32xbf16, #tpu.memory_space<vmem>>, %arg4: memref<1x32xf32, #tpu.memory_space<vmem>>, %arg5: memref<32x32xbf16, #tpu.memory_space<vmem>>, %arg6: memref<1x32xf32, #tpu.memory_space<vmem>>, %arg7: memref<32x32xbf16, #tpu.memory_space<vmem>>, %arg8: memref<1x32xf32, #tpu.memory_space<vmem>>, %arg9: memref<32x16xbf16, #tpu.memory_space<vmem>>, %arg10: memref<1x16xf32, #tpu.memory_space<vmem>>, %arg11: memref<16x32xbf16, #tpu.memory_space<vmem>>, %arg12: memref<16x32xbf16, #tpu.memory_space<vmem>>, %arg13: memref<32x32xbf16, #tpu.memory_space<vmem>>, %arg14: memref<1x32xf32, #tpu.memory_space<vmem>>, %arg15: memref<1x8x32xf32, #tpu.memory_space<vmem>>, %arg16: memref<8x32xbf16, #tpu.memory_space<vmem>>, %arg17: memref<8x32xbf16, #tpu.memory_space<vmem>>, %arg18: memref<8x32xf32, #tpu.memory_space<vmem>>) attributes {dimension_semantics = [#tpu.dimension_semantics<parallel>, #tpu.dimension_semantics<arbitrary>], iteration_bounds = array<i64: 2, 1>, scalar_prefetch = 0 : i64, scratch_operands = 3 : i64, tpu.core_type = #tpu.core_type<tc>, window_params = [{transform_indices = @transform_0, window_bounds = array<i64: 1, 8, 32>}, {pipeline_mode = #tpu.pipeline_mode<synchronous>, transform_indices = @transform_1, window_bounds = array<i64: 32, 32>}, {pipeline_mode = #tpu.pipeline_mode<synchronous>, transform_indices = @transform_2, window_bounds = array<i64: 1, 32>}, {pipeline_mode = #tpu.pipeline_mode<synchronous>, transform_indices = @transform_3, window_bounds = array<i64: 32, 32>}, {pipeline_mode = #tpu.pipeline_mode<synchronous>, transform_indices = @transform_4, window_bounds = array<i64: 1, 32>}, {pipeline_mode = #tpu.pipeline_mode<synchronous>, transform_indices = @transform_5, window_bounds = array<i64: 32, 32>}, {pipeline_mode = #tpu.pipeline_mode<synchronous>, transform_indices = @transform_6, window_bounds = array<i64: 1, 32>}, {pipeline_mode = #tpu.pipeline_mode<synchronous>, transform_indices = @transform_7, window_bounds = array<i64: 32, 16>}, {pipeline_mode = #tpu.pipeline_mode<synchronous>, transform_indices = @transform_8, window_bounds = array<i64: 1, 16>}, {pipeline_mode = #tpu.pipeline_mode<synchronous>, transform_indices = @transform_9, window_bounds = array<i64: 16, 32>}, {pipeline_mode = #tpu.pipeline_mode<synchronous>, transform_indices = @transform_10, window_bounds = array<i64: 16, 32>}, {pipeline_mode = #tpu.pipeline_mode<synchronous>, transform_indices = @transform_11, window_bounds = array<i64: 32, 32>}, {pipeline_mode = #tpu.pipeline_mode<synchronous>, transform_indices = @transform_12, window_bounds = array<i64: 1, 32>}, {transform_indices = @transform_13, window_bounds = array<i64: 1, 8, 32>}]} {
    %c0_i32 = arith.constant 0 : i32
    %0 = arith.cmpi eq, %arg1, %c0_i32 : i32
    %1 = arith.extui %0 : i1 to i32
    %c0_i32_0 = arith.constant 0 : i32
    %2 = arith.cmpi ne, %1, %c0_i32_0 : i32
    scf.if %2 {
      %c0_56 = arith.constant 0 : index
      %c0_57 = arith.constant 0 : index
      %c0_58 = arith.constant 0 : index
      %110 = vector.load %arg2[%c0_56, %c0_57, %c0_58] : memref<1x8x32xf32, #tpu.memory_space<vmem>>, vector<1x8x32xf32>
      %111 = vector.shape_cast %110 : vector<1x8x32xf32> to vector<8x32xf32>
      %112 = arith.truncf %111 : vector<8x32xf32> to vector<8x32xbf16>
      %c0_59 = arith.constant 0 : index
      %c0_60 = arith.constant 0 : index
      %113 = vector.load %arg9[%c0_59, %c0_60] : memref<32x16xbf16, #tpu.memory_space<vmem>>, vector<32x16xbf16>
      %cst_61 = arith.constant dense<0.000000e+00> : vector<8x16xf32>
      %114 = tpu.matmul %112, %113, %cst_61 {dimension_numbers = #tpu.dot_dimension_numbers<[1], [0], [0], [1], [0, 0, 1, 1], [], []>} : vector<8x32xbf16>, vector<32x16xbf16>, vector<8x16xf32> -> vector<8x16xf32>
      %c0_62 = arith.constant 0 : index
      %c0_63 = arith.constant 0 : index
      %115 = vector.load %arg10[%c0_62, %c0_63] : memref<1x16xf32, #tpu.memory_space<vmem>>, vector<1x16xf32>
      %116 = vector.broadcast %115 : vector<1x16xf32> to vector<8x16xf32>
      %117 = arith.addf %114, %116 : vector<8x16xf32>
      %118 = math.tanh %117 : vector<8x16xf32>
      %119 = arith.truncf %118 : vector<8x16xf32> to vector<8x16xbf16>
      %c0_64 = arith.constant 0 : index
      %c0_65 = arith.constant 0 : index
      %120 = vector.load %arg5[%c0_64, %c0_65] : memref<32x32xbf16, #tpu.memory_space<vmem>>, vector<32x32xbf16>
      %cst_66 = arith.constant dense<0.000000e+00> : vector<8x32xf32>
      %121 = tpu.matmul %112, %120, %cst_66 {dimension_numbers = #tpu.dot_dimension_numbers<[1], [0], [0], [1], [0, 0, 1, 1], [], []>} : vector<8x32xbf16>, vector<32x32xbf16>, vector<8x32xf32> -> vector<8x32xf32>
      %c0_67 = arith.constant 0 : index
      %c0_68 = arith.constant 0 : index
      %122 = vector.load %arg11[%c0_67, %c0_68] : memref<16x32xbf16, #tpu.memory_space<vmem>>, vector<16x32xbf16>
      %cst_69 = arith.constant dense<0.000000e+00> : vector<8x32xf32>
      %123 = tpu.matmul %119, %122, %cst_69 {dimension_numbers = #tpu.dot_dimension_numbers<[1], [0], [0], [1], [0, 0, 1, 1], [], []>} : vector<8x16xbf16>, vector<16x32xbf16>, vector<8x32xf32> -> vector<8x32xf32>
      %124 = arith.addf %121, %123 : vector<8x32xf32>
      %c0_70 = arith.constant 0 : index
      %c0_71 = arith.constant 0 : index
      %125 = vector.load %arg6[%c0_70, %c0_71] : memref<1x32xf32, #tpu.memory_space<vmem>>, vector<1x32xf32>
      %126 = vector.broadcast %125 : vector<1x32xf32> to vector<8x32xf32>
      %127 = arith.addf %124, %126 : vector<8x32xf32>
      %c0_72 = arith.constant 0 : index
      %c0_73 = arith.constant 0 : index
      %128 = vector.load %arg7[%c0_72, %c0_73] : memref<32x32xbf16, #tpu.memory_space<vmem>>, vector<32x32xbf16>
      %cst_74 = arith.constant dense<0.000000e+00> : vector<8x32xf32>
      %129 = tpu.matmul %112, %128, %cst_74 {dimension_numbers = #tpu.dot_dimension_numbers<[1], [0], [0], [1], [0, 0, 1, 1], [], []>} : vector<8x32xbf16>, vector<32x32xbf16>, vector<8x32xf32> -> vector<8x32xf32>
      %c0_75 = arith.constant 0 : index
      %c0_76 = arith.constant 0 : index
      %130 = vector.load %arg12[%c0_75, %c0_76] : memref<16x32xbf16, #tpu.memory_space<vmem>>, vector<16x32xbf16>
      %cst_77 = arith.constant dense<0.000000e+00> : vector<8x32xf32>
      %131 = tpu.matmul %119, %130, %cst_77 {dimension_numbers = #tpu.dot_dimension_numbers<[1], [0], [0], [1], [0, 0, 1, 1], [], []>} : vector<8x16xbf16>, vector<16x32xbf16>, vector<8x32xf32> -> vector<8x32xf32>
      %132 = arith.addf %129, %131 : vector<8x32xf32>
      %c0_78 = arith.constant 0 : index
      %c0_79 = arith.constant 0 : index
      %133 = vector.load %arg8[%c0_78, %c0_79] : memref<1x32xf32, #tpu.memory_space<vmem>>, vector<1x32xf32>
      %134 = vector.broadcast %133 : vector<1x32xf32> to vector<8x32xf32>
      %135 = arith.addf %132, %134 : vector<8x32xf32>
      %136 = arith.truncf %127 : vector<8x32xf32> to vector<8x32xbf16>
      %c0_80 = arith.constant 0 : index
      %c0_81 = arith.constant 0 : index
      %137 = vector.load %arg16[%c0_80, %c0_81] : memref<8x32xbf16, #tpu.memory_space<vmem>>, vector<8x32xbf16>
      tpu.vector_store %arg16[%c0_80, %c0_81], %136 {strides = array<i32>} : memref<8x32xbf16, #tpu.memory_space<vmem>>, vector<8x32xbf16>,
      %138 = arith.truncf %135 : vector<8x32xf32> to vector<8x32xbf16>
      %c0_82 = arith.constant 0 : index
      %c0_83 = arith.constant 0 : index
      %139 = vector.load %arg17[%c0_82, %c0_83] : memref<8x32xbf16, #tpu.memory_space<vmem>>, vector<8x32xbf16>
      tpu.vector_store %arg17[%c0_82, %c0_83], %138 {strides = array<i32>} : memref<8x32xbf16, #tpu.memory_space<vmem>>, vector<8x32xbf16>,
    } else {
    }
    %c8_i32 = arith.constant 8 : i32
    %3 = arith.muli %arg1, %c8_i32 : i32
    %4 = tpu.assume_multiple %3, 8 : i32
    %c0 = arith.constant 0 : index
    %5 = arith.index_cast %4 : i32 to index
    %c0_1 = arith.constant 0 : index
    %6 = vector.load %arg2[%c0, %5, %c0_1] : memref<1x8x32xf32, #tpu.memory_space<vmem>>, vector<1x8x32xf32>
    %7 = vector.shape_cast %6 : vector<1x8x32xf32> to vector<8x32xf32>
    %8 = arith.truncf %7 : vector<8x32xf32> to vector<8x32xbf16>
    %c0_2 = arith.constant 0 : index
    %c0_3 = arith.constant 0 : index
    %9 = vector.load %arg3[%c0_2, %c0_3] : memref<32x32xbf16, #tpu.memory_space<vmem>>, vector<32x32xbf16>
    %cst = arith.constant dense<0.000000e+00> : vector<8x32xf32>
    %10 = tpu.matmul %8, %9, %cst {dimension_numbers = #tpu.dot_dimension_numbers<[1], [0], [0], [1], [0, 0, 1, 1], [], []>} : vector<8x32xbf16>, vector<32x32xbf16>, vector<8x32xf32> -> vector<8x32xf32>
    %c0_4 = arith.constant 0 : index
    %c0_5 = arith.constant 0 : index
    %11 = vector.load %arg4[%c0_4, %c0_5] : memref<1x32xf32, #tpu.memory_space<vmem>>, vector<1x32xf32>
    %12 = vector.broadcast %11 : vector<1x32xf32> to vector<8x32xf32>
    %13 = arith.addf %10, %12 : vector<8x32xf32>
    %14 = arith.truncf %13 : vector<8x32xf32> to vector<8x32xbf16>
    %c0_6 = arith.constant 0 : index
    %c0_7 = arith.constant 0 : index
    %15 = vector.load %arg16[%c0_6, %c0_7] : memref<8x32xbf16, #tpu.memory_space<vmem>>, vector<8x32xbf16>
    %c0_8 = arith.constant 0 : index
    %c0_9 = arith.constant 0 : index
    %16 = vector.load %arg17[%c0_8, %c0_9] : memref<8x32xbf16, #tpu.memory_space<vmem>>, vector<8x32xbf16>
    %17 = vector.extract_strided_slice %14 {offsets = [0, 0], sizes = [8, 8], strides = [1, 1]} : vector<8x32xbf16> to vector<8x8xbf16>
    %18 = vector.extract_strided_slice %15 {offsets = [0, 0], sizes = [8, 8], strides = [1, 1]} : vector<8x32xbf16> to vector<8x8xbf16>
    %19 = vector.extract_strided_slice %16 {offsets = [0, 0], sizes = [8, 8], strides = [1, 1]} : vector<8x32xbf16> to vector<8x8xbf16>
    %cst_10 = arith.constant dense<0.000000e+00> : vector<8x8xf32>
    %20 = tpu.matmul %17, %18, %cst_10 {dimension_numbers = #tpu.dot_dimension_numbers<[1], [1], [0], [0], [0, 0, 1, 0], [], []>} : vector<8x8xbf16>, vector<8x8xbf16>, vector<8x8xf32> -> vector<8x8xf32>
    %cst_11 = arith.constant dense<0xFF800000> : vector<8xf32>
    %21 = vector.multi_reduction <maximumf>, %20, %cst_11 [1] : vector<8x8xf32> to vector<8xf32>
    %22 = vector.shape_cast %21 : vector<8xf32> to vector<8x1xf32>
    %23 = vector.broadcast %22 : vector<8x1xf32> to vector<8x8xf32>
    %24 = arith.subf %20, %23 : vector<8x8xf32>
    %25 = math.exp %24 : vector<8x8xf32>
    %cst_12 = arith.constant dense<0.000000e+00> : vector<8xf32>
    %26 = vector.multi_reduction <add>, %25, %cst_12 [1] : vector<8x8xf32> to vector<8xf32>
    %27 = vector.shape_cast %26 : vector<8xf32> to vector<8x1xf32>
    %28 = tpu.reciprocal %27 {approx = true} : vector<8x1xf32> -> vector<8x1xf32>
    %29 = vector.broadcast %28 : vector<8x1xf32> to vector<8x8xf32>
    %30 = arith.mulf %25, %29 : vector<8x8xf32>
    %31 = arith.truncf %30 : vector<8x8xf32> to vector<8x8xbf16>
    %cst_13 = arith.constant dense<0.000000e+00> : vector<8x8xf32>
    %32 = tpu.matmul %31, %19, %cst_13 {dimension_numbers = #tpu.dot_dimension_numbers<[1], [0], [0], [1], [0, 0, 1, 1], [], []>} : vector<8x8xbf16>, vector<8x8xbf16>, vector<8x8xf32> -> vector<8x8xf32>
    %33 = arith.truncf %32 : vector<8x8xf32> to vector<8x8xbf16>
    %c0_14 = arith.constant 0 : index
    %c0_15 = arith.constant 0 : index
    %34 = vector.load %arg13[%c0_14, %c0_15] : memref<32x32xbf16, #tpu.memory_space<vmem>>, vector<8x32xbf16>
    %cst_16 = arith.constant dense<0.000000e+00> : vector<8x32xf32>
    %35 = tpu.matmul %33, %34, %cst_16 {dimension_numbers = #tpu.dot_dimension_numbers<[1], [0], [0], [1], [0, 0, 1, 1], [], []>} : vector<8x8xbf16>, vector<8x32xbf16>, vector<8x32xf32> -> vector<8x32xf32>
    %c0_17 = arith.constant 0 : index
    %c0_18 = arith.constant 0 : index
    %36 = vector.load %arg18[%c0_17, %c0_18] : memref<8x32xf32, #tpu.memory_space<vmem>>, vector<8x32xf32>
    tpu.vector_store %arg18[%c0_17, %c0_18], %35 {strides = array<i32>} : memref<8x32xf32, #tpu.memory_space<vmem>>, vector<8x32xf32>,
    %37 = vector.extract_strided_slice %14 {offsets = [0, 8], sizes = [8, 8], strides = [1, 1]} : vector<8x32xbf16> to vector<8x8xbf16>
    %38 = vector.extract_strided_slice %15 {offsets = [0, 8], sizes = [8, 8], strides = [1, 1]} : vector<8x32xbf16> to vector<8x8xbf16>
    %39 = vector.extract_strided_slice %16 {offsets = [0, 8], sizes = [8, 8], strides = [1, 1]} : vector<8x32xbf16> to vector<8x8xbf16>
    %cst_19 = arith.constant dense<0.000000e+00> : vector<8x8xf32>
    %40 = tpu.matmul %37, %38, %cst_19 {dimension_numbers = #tpu.dot_dimension_numbers<[1], [1], [0], [0], [0, 0, 1, 0], [], []>} : vector<8x8xbf16>, vector<8x8xbf16>, vector<8x8xf32> -> vector<8x8xf32>
    %cst_20 = arith.constant dense<0xFF800000> : vector<8xf32>
    %41 = vector.multi_reduction <maximumf>, %40, %cst_20 [1] : vector<8x8xf32> to vector<8xf32>
    %42 = vector.shape_cast %41 : vector<8xf32> to vector<8x1xf32>
    %43 = vector.broadcast %42 : vector<8x1xf32> to vector<8x8xf32>
    %44 = arith.subf %40, %43 : vector<8x8xf32>
    %45 = math.exp %44 : vector<8x8xf32>
    %cst_21 = arith.constant dense<0.000000e+00> : vector<8xf32>
    %46 = vector.multi_reduction <add>, %45, %cst_21 [1] : vector<8x8xf32> to vector<8xf32>
    %47 = vector.shape_cast %46 : vector<8xf32> to vector<8x1xf32>
    %48 = tpu.reciprocal %47 {approx = true} : vector<8x1xf32> -> vector<8x1xf32>
    %49 = vector.broadcast %48 : vector<8x1xf32> to vector<8x8xf32>
    %50 = arith.mulf %45, %49 : vector<8x8xf32>
    %51 = arith.truncf %50 : vector<8x8xf32> to vector<8x8xbf16>
    %cst_22 = arith.constant dense<0.000000e+00> : vector<8x8xf32>
    %52 = tpu.matmul %51, %39, %cst_22 {dimension_numbers = #tpu.dot_dimension_numbers<[1], [0], [0], [1], [0, 0, 1, 1], [], []>} : vector<8x8xbf16>, vector<8x8xbf16>, vector<8x8xf32> -> vector<8x8xf32>
    %53 = arith.truncf %52 : vector<8x8xf32> to vector<8x8xbf16>
    %c8 = arith.constant 8 : index
    %c0_23 = arith.constant 0 : index
    %54 = vector.load %arg13[%c8, %c0_23] : memref<32x32xbf16, #tpu.memory_space<vmem>>, vector<8x32xbf16>
    %cst_24 = arith.constant dense<0.000000e+00> : vector<8x32xf32>
    %55 = tpu.matmul %53, %54, %cst_24 {dimension_numbers = #tpu.dot_dimension_numbers<[1], [0], [0], [1], [0, 0, 1, 1], [], []>} : vector<8x8xbf16>, vector<8x32xbf16>, vector<8x32xf32> -> vector<8x32xf32>
    %c0_25 = arith.constant 0 : index
    %c0_26 = arith.constant 0 : index
    %56 = vector.load %arg18[%c0_25, %c0_26] : memref<8x32xf32, #tpu.memory_space<vmem>>, vector<8x32xf32>
    %57 = arith.addf %56, %55 : vector<8x32xf32>
    %c0_27 = arith.constant 0 : index
    %c0_28 = arith.constant 0 : index
    %58 = vector.load %arg18[%c0_27, %c0_28] : memref<8x32xf32, #tpu.memory_space<vmem>>, vector<8x32xf32>
    tpu.vector_store %arg18[%c0_27, %c0_28], %57 {strides = array<i32>} : memref<8x32xf32, #tpu.memory_space<vmem>>, vector<8x32xf32>,
    %59 = vector.extract_strided_slice %14 {offsets = [0, 16], sizes = [8, 8], strides = [1, 1]} : vector<8x32xbf16> to vector<8x8xbf16>
    %60 = vector.extract_strided_slice %15 {offsets = [0, 16], sizes = [8, 8], strides = [1, 1]} : vector<8x32xbf16> to vector<8x8xbf16>
    %61 = vector.extract_strided_slice %16 {offsets = [0, 16], sizes = [8, 8], strides = [1, 1]} : vector<8x32xbf16> to vector<8x8xbf16>
    %cst_29 = arith.constant dense<0.000000e+00> : vector<8x8xf32>
    %62 = tpu.matmul %59, %60, %cst_29 {dimension_numbers = #tpu.dot_dimension_numbers<[1], [1], [0], [0], [0, 0, 1, 0], [], []>} : vector<8x8xbf16>, vector<8x8xbf16>, vector<8x8xf32> -> vector<8x8xf32>
    %cst_30 = arith.constant dense<0xFF800000> : vector<8xf32>
    %63 = vector.multi_reduction <maximumf>, %62, %cst_30 [1] : vector<8x8xf32> to vector<8xf32>
    %64 = vector.shape_cast %63 : vector<8xf32> to vector<8x1xf32>
    %65 = vector.broadcast %64 : vector<8x1xf32> to vector<8x8xf32>
    %66 = arith.subf %62, %65 : vector<8x8xf32>
    %67 = math.exp %66 : vector<8x8xf32>
    %cst_31 = arith.constant dense<0.000000e+00> : vector<8xf32>
    %68 = vector.multi_reduction <add>, %67, %cst_31 [1] : vector<8x8xf32> to vector<8xf32>
    %69 = vector.shape_cast %68 : vector<8xf32> to vector<8x1xf32>
    %70 = tpu.reciprocal %69 {approx = true} : vector<8x1xf32> -> vector<8x1xf32>
    %71 = vector.broadcast %70 : vector<8x1xf32> to vector<8x8xf32>
    %72 = arith.mulf %67, %71 : vector<8x8xf32>
    %73 = arith.truncf %72 : vector<8x8xf32> to vector<8x8xbf16>
    %cst_32 = arith.constant dense<0.000000e+00> : vector<8x8xf32>
    %74 = tpu.matmul %73, %61, %cst_32 {dimension_numbers = #tpu.dot_dimension_numbers<[1], [0], [0], [1], [0, 0, 1, 1], [], []>} : vector<8x8xbf16>, vector<8x8xbf16>, vector<8x8xf32> -> vector<8x8xf32>
    %75 = arith.truncf %74 : vector<8x8xf32> to vector<8x8xbf16>
    %c16 = arith.constant 16 : index
    %c0_33 = arith.constant 0 : index
    %76 = vector.load %arg13[%c16, %c0_33] : memref<32x32xbf16, #tpu.memory_space<vmem>>, vector<8x32xbf16>
    %cst_34 = arith.constant dense<0.000000e+00> : vector<8x32xf32>
    %77 = tpu.matmul %75, %76, %cst_34 {dimension_numbers = #tpu.dot_dimension_numbers<[1], [0], [0], [1], [0, 0, 1, 1], [], []>} : vector<8x8xbf16>, vector<8x32xbf16>, vector<8x32xf32> -> vector<8x32xf32>
    %c0_35 = arith.constant 0 : index
    %c0_36 = arith.constant 0 : index
    %78 = vector.load %arg18[%c0_35, %c0_36] : memref<8x32xf32, #tpu.memory_space<vmem>>, vector<8x32xf32>
    %79 = arith.addf %78, %77 : vector<8x32xf32>
    %c0_37 = arith.constant 0 : index
    %c0_38 = arith.constant 0 : index
    %80 = vector.load %arg18[%c0_37, %c0_38] : memref<8x32xf32, #tpu.memory_space<vmem>>, vector<8x32xf32>
    tpu.vector_store %arg18[%c0_37, %c0_38], %79 {strides = array<i32>} : memref<8x32xf32, #tpu.memory_space<vmem>>, vector<8x32xf32>,
    %81 = vector.extract_strided_slice %14 {offsets = [0, 24], sizes = [8, 8], strides = [1, 1]} : vector<8x32xbf16> to vector<8x8xbf16>
    %82 = vector.extract_strided_slice %15 {offsets = [0, 24], sizes = [8, 8], strides = [1, 1]} : vector<8x32xbf16> to vector<8x8xbf16>
    %83 = vector.extract_strided_slice %16 {offsets = [0, 24], sizes = [8, 8], strides = [1, 1]} : vector<8x32xbf16> to vector<8x8xbf16>
    %cst_39 = arith.constant dense<0.000000e+00> : vector<8x8xf32>
    %84 = tpu.matmul %81, %82, %cst_39 {dimension_numbers = #tpu.dot_dimension_numbers<[1], [1], [0], [0], [0, 0, 1, 0], [], []>} : vector<8x8xbf16>, vector<8x8xbf16>, vector<8x8xf32> -> vector<8x8xf32>
    %cst_40 = arith.constant dense<0xFF800000> : vector<8xf32>
    %85 = vector.multi_reduction <maximumf>, %84, %cst_40 [1] : vector<8x8xf32> to vector<8xf32>
    %86 = vector.shape_cast %85 : vector<8xf32> to vector<8x1xf32>
    %87 = vector.broadcast %86 : vector<8x1xf32> to vector<8x8xf32>
    %88 = arith.subf %84, %87 : vector<8x8xf32>
    %89 = math.exp %88 : vector<8x8xf32>
    %cst_41 = arith.constant dense<0.000000e+00> : vector<8xf32>
    %90 = vector.multi_reduction <add>, %89, %cst_41 [1] : vector<8x8xf32> to vector<8xf32>
    %91 = vector.shape_cast %90 : vector<8xf32> to vector<8x1xf32>
    %92 = tpu.reciprocal %91 {approx = true} : vector<8x1xf32> -> vector<8x1xf32>
    %93 = vector.broadcast %92 : vector<8x1xf32> to vector<8x8xf32>
    %94 = arith.mulf %89, %93 : vector<8x8xf32>
    %95 = arith.truncf %94 : vector<8x8xf32> to vector<8x8xbf16>
    %cst_42 = arith.constant dense<0.000000e+00> : vector<8x8xf32>
    %96 = tpu.matmul %95, %83, %cst_42 {dimension_numbers = #tpu.dot_dimension_numbers<[1], [0], [0], [1], [0, 0, 1, 1], [], []>} : vector<8x8xbf16>, vector<8x8xbf16>, vector<8x8xf32> -> vector<8x8xf32>
    %97 = arith.truncf %96 : vector<8x8xf32> to vector<8x8xbf16>
    %c24 = arith.constant 24 : index
    %c0_43 = arith.constant 0 : index
    %98 = vector.load %arg13[%c24, %c0_43] : memref<32x32xbf16, #tpu.memory_space<vmem>>, vector<8x32xbf16>
    %cst_44 = arith.constant dense<0.000000e+00> : vector<8x32xf32>
    %99 = tpu.matmul %97, %98, %cst_44 {dimension_numbers = #tpu.dot_dimension_numbers<[1], [0], [0], [1], [0, 0, 1, 1], [], []>} : vector<8x8xbf16>, vector<8x32xbf16>, vector<8x32xf32> -> vector<8x32xf32>
    %c0_45 = arith.constant 0 : index
    %c0_46 = arith.constant 0 : index
    %100 = vector.load %arg18[%c0_45, %c0_46] : memref<8x32xf32, #tpu.memory_space<vmem>>, vector<8x32xf32>
    %101 = arith.addf %100, %99 : vector<8x32xf32>
    %c0_47 = arith.constant 0 : index
    %c0_48 = arith.constant 0 : index
    %102 = vector.load %arg18[%c0_47, %c0_48] : memref<8x32xf32, #tpu.memory_space<vmem>>, vector<8x32xf32>
    tpu.vector_store %arg18[%c0_47, %c0_48], %101 {strides = array<i32>} : memref<8x32xf32, #tpu.memory_space<vmem>>, vector<8x32xf32>,
    %c0_49 = arith.constant 0 : index
    %c0_50 = arith.constant 0 : index
    %103 = vector.load %arg18[%c0_49, %c0_50] : memref<8x32xf32, #tpu.memory_space<vmem>>, vector<8x32xf32>
    %c0_51 = arith.constant 0 : index
    %c0_52 = arith.constant 0 : index
    %104 = vector.load %arg14[%c0_51, %c0_52] : memref<1x32xf32, #tpu.memory_space<vmem>>, vector<1x32xf32>
    %105 = vector.broadcast %104 : vector<1x32xf32> to vector<8x32xf32>
    %106 = arith.addf %103, %105 : vector<8x32xf32>
    %c0_53 = arith.constant 0 : index
    %c0_54 = arith.constant 0 : index
    %c0_55 = arith.constant 0 : index
    %107 = vector.load %arg15[%c0_53, %c0_54, %c0_55] : memref<1x8x32xf32, #tpu.memory_space<vmem>>, vector<1x8x32xf32>
    %108 = vector.shape_cast %107 : vector<1x8x32xf32> to vector<8x32xf32>
    %109 = vector.shape_cast %106 : vector<8x32xf32> to vector<1x8x32xf32>
    tpu.vector_store %arg15[%c0_53, %c0_54, %c0_55], %109 {strides = array<i32>} : memref<1x8x32xf32, #tpu.memory_space<vmem>>, vector<1x8x32xf32>,
    return
  }
  func.func @transform_0(%arg0: i32, %arg1: i32) -> (i32, i32, i32) {
    %c0_i32 = arith.constant 0 : i32
    %c0_i32_0 = arith.constant 0 : i32
    %c0_i32_1 = arith.constant 0 : i32
    return %arg0, %c0_i32, %c0_i32_0 : i32, i32, i32
  }
  func.func @transform_1(%arg0: i32, %arg1: i32) -> (i32, i32) {
    %c0_i32 = arith.constant 0 : i32
    %c0_i32_0 = arith.constant 0 : i32
    %c0_i32_1 = arith.constant 0 : i32
    return %c0_i32, %c0_i32_0 : i32, i32
  }
  func.func @transform_2(%arg0: i32, %arg1: i32) -> (i32, i32) {
    %c0_i32 = arith.constant 0 : i32
    %c0_i32_0 = arith.constant 0 : i32
    %c0_i32_1 = arith.constant 0 : i32
    return %c0_i32, %c0_i32_0 : i32, i32
  }
  func.func @transform_3(%arg0: i32, %arg1: i32) -> (i32, i32) {
    %c0_i32 = arith.constant 0 : i32
    %c0_i32_0 = arith.constant 0 : i32
    %c0_i32_1 = arith.constant 0 : i32
    return %c0_i32, %c0_i32_0 : i32, i32
  }
  func.func @transform_4(%arg0: i32, %arg1: i32) -> (i32, i32) {
    %c0_i32 = arith.constant 0 : i32
    %c0_i32_0 = arith.constant 0 : i32
    %c0_i32_1 = arith.constant 0 : i32
    return %c0_i32, %c0_i32_0 : i32, i32
  }
  func.func @transform_5(%arg0: i32, %arg1: i32) -> (i32, i32) {
    %c0_i32 = arith.constant 0 : i32
    %c0_i32_0 = arith.constant 0 : i32
    %c0_i32_1 = arith.constant 0 : i32
    return %c0_i32, %c0_i32_0 : i32, i32
  }
  func.func @transform_6(%arg0: i32, %arg1: i32) -> (i32, i32) {
    %c0_i32 = arith.constant 0 : i32
    %c0_i32_0 = arith.constant 0 : i32
    %c0_i32_1 = arith.constant 0 : i32
    return %c0_i32, %c0_i32_0 : i32, i32
  }
  func.func @transform_7(%arg0: i32, %arg1: i32) -> (i32, i32) {
    %c0_i32 = arith.constant 0 : i32
    %c0_i32_0 = arith.constant 0 : i32
    %c0_i32_1 = arith.constant 0 : i32
    return %c0_i32, %c0_i32_0 : i32, i32
  }
  func.func @transform_8(%arg0: i32, %arg1: i32) -> (i32, i32) {
    %c0_i32 = arith.constant 0 : i32
    %c0_i32_0 = arith.constant 0 : i32
    %c0_i32_1 = arith.constant 0 : i32
    return %c0_i32, %c0_i32_0 : i32, i32
  }
  func.func @transform_9(%arg0: i32, %arg1: i32) -> (i32, i32) {
    %c0_i32 = arith.constant 0 : i32
    %c0_i32_0 = arith.constant 0 : i32
    %c0_i32_1 = arith.constant 0 : i32
    return %c0_i32, %c0_i32_0 : i32, i32
  }
  func.func @transform_10(%arg0: i32, %arg1: i32) -> (i32, i32) {
    %c0_i32 = arith.constant 0 : i32
    %c0_i32_0 = arith.constant 0 : i32
    %c0_i32_1 = arith.constant 0 : i32
    return %c0_i32, %c0_i32_0 : i32, i32
  }
  func.func @transform_11(%arg0: i32, %arg1: i32) -> (i32, i32) {
    %c0_i32 = arith.constant 0 : i32
    %c0_i32_0 = arith.constant 0 : i32
    %c0_i32_1 = arith.constant 0 : i32
    return %c0_i32, %c0_i32_0 : i32, i32
  }
  func.func @transform_12(%arg0: i32, %arg1: i32) -> (i32, i32) {
    %c0_i32 = arith.constant 0 : i32
    %c0_i32_0 = arith.constant 0 : i32
    %c0_i32_1 = arith.constant 0 : i32
    return %c0_i32, %c0_i32_0 : i32, i32
  }
  func.func @transform_13(%arg0: i32, %arg1: i32) -> (i32, i32, i32) {
    %c0_i32 = arith.constant 0 : i32
    %c0_i32_0 = arith.constant 0 : i32
    return %arg0, %arg1, %c0_i32 : i32, i32, i32
  }
}

</mosaic_0001>

<bundles_post_ra>
// kernel: tpu_custom_call.1
= control target key start
LH: loop header
LB: loop body
LE: loop exit
PB: predicated region body
PF: predicated region fallthrough
CT: control target
= control target key end

     0   :  { %s2776_s0 = inlined_call_operand.vmem [shape: f32[2,8,32], index: 0, kind: input, shape index: {}]   ;;  %s2777_s1 = inlined_call_operand.hbm [shape: bf16[32,32], index: 1, kind: input, shape index: {}]   ;;  %s2778_s2 = inlined_call_operand.vmem [shape: f32[1,32], index: 2, kind: input, shape index: {}]   ;;  %s2779_s3 = inlined_call_operand.vmem [shape: bf16[32,32], index: 3, kind: input, shape index: {}]   ;;  %s2780_s4 = inlined_call_operand.vmem [shape: f32[1,32], index: 4, kind: input, shape index: {}]   ;;  %s2781_s5 = inlined_call_operand.hbm [shape: bf16[32,32], index: 5, kind: input, shape index: {}]   ;;  %s2782_s6 = inlined_call_operand.hbm [shape: f32[1,32], index: 6, kind: input, shape index: {}]   ;;  %s2783_s7 = inlined_call_operand.vmem [shape: bf16[32,16], index: 7, kind: input, shape index: {}]   ;;  %s2784_s8 = inlined_call_operand.hbm [shape: f32[1,16], index: 8, kind: input, shape index: {}]   ;;  %s2785_s9 = inlined_call_operand.vmem [shape: bf16[16,32], index: 9, kind: input, shape index: {}]   ;;  %s2786_s10 = inlined_call_operand.hbm [shape: bf16[16,32], index: 10, kind: input, shape index: {}]   ;;  %s2787_s11 = inlined_call_operand.vmem [shape: bf16[32,32], index: 11, kind: input, shape index: {}]   ;;  %s2788_s12 = inlined_call_operand.vmem [shape: f32[1,32], index: 12, kind: input, shape index: {}]   ;;  %s2789_s13 = inlined_call_operand.hbm [shape: f32[2,8,32], index: 13, kind: output, shape index: {}]  }
   0x1   :  { %2808 = sst [smem:[#allocation27_spill]] %s2777_s1 }
   0x2   :  { %2809 = sst [smem:[#allocation28_spill]] %s2788_s12 }
   0x3   :  { %2810 = sst [smem:[#allocation29_spill]] %s2789_s13 }
   0x4   :  { %18 = vsyncpa [#allocation6], 0 }
   0x5   :  { %19 = vsyncpa [#allocation9], 0 }
   0x6   :  { %20 = vsyncpa [#allocation12], 0 }
   0x7   :  { %21 = vsyncpa [#allocation7], 0 }
   0x8   :  { %23 = vsyncpa [#allocation7 + $0x1], 0  ;;  %s2362_s25 = smov 0   ;;  %s2364_s26 = smov 0  }
   0x9   :  { %s2366_s27 = smov 0   ;;  %s2368_s28 = smov 0  }
   0xa   :  { %s2370_s29 = smov 0   ;;  %s2372_s30 = smov 0  }
   0xb LB: > { %2811 = sst [smem:[#allocation19_spill]] %s2257_s25  ;;  %s1692_s14 = sadd.s32 4294967295, %s2277_s30   ;;  %s2277_s30 = sphi %s2372_s30, %s29_s30   ;;  %s2273_s29 = sphi %s2370_s29, %s2842_s29   ;;  %s2269_s28 = sphi %s2368_s28, %s2845_s28   ;;  %s2265_s27 = sphi %s2366_s27, %s2840_s27   ;;  %s2261_s26 = sphi %s2364_s26, %s2844_s26   ;;  %s2257_s25 = sphi %s2362_s25, %s2843_s25  }
   0xc   : > { %2812 = sst [smem:[#allocation20_spill]] %s2265_s27  ;;  %s1693_s15 = sadd.s32 4294967294, %s2277_s30  }
   0xd   : > { %2813 = sst [smem:[#allocation21_spill]] %s2273_s29  ;;  %s41_s16 = sadd.s32 1, %s2273_s29 }
   0xe   : > { %2814 = sst [smem:[#allocation22_spill]] %s2277_s30  ;;  %s328_s17 = sadd.s32 1, %s2265_s27 }
   0xf   : > { %p43_p0 = scmp.ge.s32.totalorder %s41_s16, 2  ;;  %p338_p1 = scmp.ne.s32.totalorder %s2265_s27, %s2261_s26 }
  0x10   : > { %p339_p2 = scmp.eq.s32.totalorder %s1692_s14, 1  ;;  %p344_p3 = scmp.ne.s32.totalorder %s2261_s26, %s2257_s25 }
  0x11   : > { %s2847_s16 = smov (%p43_p0, %s41_s16), 0  ;;  %p345_p5 = scmp.eq.s32.totalorder %s1693_s15, 1 }
  0x12   : > { %2815 = sst [smem:[#allocation23_spill]] %s2847_s16  ;;  %p2402_p4 = por %p339_p2, %p338_p1 }
  0x13   : > { %s323_s19 = ssub.s32 %s2273_s29, %s2847_s16  ;;  %p1694_p6 = scmp.ge.s32.totalorder %s2277_s30, 1 }
  0x14   : > { %s2816_s18 = scalar_select %p2402_p4, 1, 0 }
  0x15   : > { %p326_p7 = scmp.eq.s32.totalorder %s323_s19, 0  ;;  %p2409_p8 = por %p345_p5, %p344_p3 }
  0x16   : > { %2817 = sst [smem:[#allocation24_spill]] %s2816_s18  ;;  %p352_p9 = scmp.lt.s32.totalorder %s2277_s30, 3 }
  0x17   : > { %s2818_s20 = scalar_select %p2409_p8, 1, 0 }
  0x18   : > { %s2415_s21 = scalar_select %p326_p7, %s2265_s27, %s328_s17  }
  0x19   : > { %2819 = sst [smem:[#allocation25_spill]] %s2818_s20  ;;  %p2417_p10 = pnand %p1694_p6, %p352_p9 }
  0x1a   : > { %2820 = sst [smem:[#allocation26_spill]] %s2415_s21  ;;  %p2421_p11 = scmp.eq.s32.totalorder %s1692_s14, 0 }
  0x1b   : > { %s2821_s22 = scalar_select %p2417_p10, 1, 0 }
  0x1c   : > { %s2822_s23 = scalar_select %p2421_p11, 1, 0 }
  0x1d   : > { %p1926_p12 = pneg %p2417_p10  ;;  %s2279_s24 = smov [#allocation8]  }
  0x1e   : > { %s386_s15 = sshll.u32 %s2279_s24, 4  ;;  %s2280_s17 = smov [#allocation11]   ;;  %s387_s15 = int_to_ptr.vmem [resolvable:$true] %s386_s15 }
  0x1f   : > { %p2429_p13 = pnand %p2421_p11, %p1926_p12  ;;  %s414_s16 = sshll.u32 %s2280_s17, 4  ;;  %s2433_s16 = int_to_ptr.vmem [resolvable:$true] %s414_s16 }
  0x20   : > { %s2047_s21 = scalar_lea.hbm %s2781_s5, 256 }
  0x21   : > { %p2048_p0 = scmp.ne.s32.totalorder %s2781_s5, %s2047_s21  ;;  %p2443_p1 = pneg %p2429_p13 }
  0x22   : > { %p2054_p5 = scmp.lt.u32.totalorder %s2047_s21, %s2781_s5 }
  0x23   : > { %p2050_p2 = pnand %p2443_p1, %p2048_p0 }
  0x25   : > { %p2051_p3 = pneg %p2050_p2 }
  0x27   : > { %p2056_p6 = pnand %p2054_p5, %p2051_p3 }
  0x29   : > { %2059 = shalt.err (!%p2056_p6)
}
  0x2a   : > { %s2060_s29 = scalar_lea.vmem %s387_s15, 256  ;;  %p2068_p8 = scmp.lt.s32.totalorder %s387_s15, %s387_s15 }
  0x2b   : > { %p2061_p7 = scmp.ne.s32.totalorder %s387_s15, %s2060_s29  ;;  %p2069_p4 = scmp.lt.s32.totalorder %s2060_s29, %s2060_s29 }
  0x2d   : > { %p2063_p9 = pnand %p2061_p7, %p2443_p1  ;;  %p2070_p11 = por %p2069_p4, %p2068_p8 }
  0x2f   : > { %p2064_p12 = pneg %p2063_p9 }
  0x31   : > { %p2071_p10 = pnand %p2070_p11, %p2064_p12 }
  0x33   : > { %2074 = shalt.err (!%p2071_p10)
}
  0x34   : > { %s2804_s27 = smov 64   ;;  %s2806_s20 = smov 4  }
  0x35   : > { %1932 = dma.hbm_to_vmem [thread:$0]  (!%p2429_p13), %s2781_s5, 256, %s387_s15, [#allocation9], %s2804_s27, %s2804_s27, %s2806_s20  }
  0x36   : > { %s2075_s30 = scalar_lea.hbm %s2784_s8, 16 }
  0x37   : > { %p2076_p4 = scmp.ne.s32.totalorder %s2784_s8, %s2075_s30  ;;  %p2082_p11 = scmp.lt.u32.totalorder %s2075_s30, %s2784_s8 }
  0x39   : > { %p2078_p8 = pnand %p2076_p4, %p2443_p1 }
  0x3b   : > { %p2079_p10 = pneg %p2078_p8 }
  0x3d   : > { %p2084_p0 = pnand %p2082_p11, %p2079_p10 }
  0x3f   : > { %2087 = shalt.err (!%p2084_p0)
}
  0x40   : > { %s2088_s15 = scalar_lea.vmem %s2433_s16, 16  ;;  %s2095_s13 = scalar_lea.vmem %s2433_s16, 32 }
  0x41   : > { %p2089_p2 = scmp.ne.s32.totalorder %s2433_s16, %s2088_s15  ;;  %p2096_p6 = scmp.lt.s32.totalorder %s2433_s16, %s2433_s16 }
  0x42   : > { %p2097_p7 = scmp.lt.s32.totalorder %s2095_s13, %s2088_s15 }
  0x43   : > { %p2091_p3 = pnand %p2089_p2, %p2443_p1 }
  0x44   : > { %p2098_p9 = por %p2097_p7, %p2096_p6 }
  0x45   : > { %p2092_p5 = pneg %p2091_p3 }
  0x47   : > { %p2099_p12 = pnand %p2098_p9, %p2092_p5 }
  0x49   : > { %2102 = shalt.err (!%p2099_p12)
}
  0x4a   : > { %1938 = dma.hbm_to_vmem [thread:$0]  (!%p2429_p13), %s2784_s8, 16, %s2433_s16, [#allocation12]  }
  0x4b   : > { %s2283_s18 = smov [#allocation5]   ;;  %s2284_s21 = smov [#allocation10]  }
  0x4c   : > { %s364_s25 = sshll.u32 %s2283_s18, 4  ;;  %s400_s14 = sshll.u32 %s2284_s21, 4  ;;  %s365_s25 = int_to_ptr.vmem [resolvable:$true] %s364_s25  ;;  %s401_s14 = int_to_ptr.vmem [resolvable:$true] %s400_s14 }
  0x4d   : > { %s2825_s1 = sld [smem:[#allocation27_spill]] }
  0x53   : > { %s2103_s15 = scalar_lea.hbm %s2825_s1, 256 }
  0x54   : > { %p2104_p4 = scmp.ne.s32.totalorder %s2825_s1, %s2103_s15  ;;  %p2110_p11 = scmp.lt.u32.totalorder %s2103_s15, %s2825_s1 }
  0x56   : > { %p2106_p8 = pnand %p2104_p4, %p2443_p1 }
  0x58   : > { %p2107_p10 = pneg %p2106_p8 }
  0x5a   : > { %p2112_p0 = pnand %p2110_p11, %p2107_p10 }
  0x5c   : > { %2115 = shalt.err (!%p2112_p0)
}
  0x5d   : > { %s2116_s16 = scalar_lea.vmem %s365_s25, 256  ;;  %p2124_p6 = scmp.lt.s32.totalorder %s365_s25, %s365_s25 }
  0x5e   : > { %p2117_p2 = scmp.ne.s32.totalorder %s365_s25, %s2116_s16  ;;  %p2125_p7 = scmp.lt.s32.totalorder %s2116_s16, %s2116_s16 }
  0x60   : > { %p2119_p3 = pnand %p2117_p2, %p2443_p1  ;;  %p2126_p9 = por %p2125_p7, %p2124_p6 }
  0x62   : > { %p2120_p5 = pneg %p2119_p3 }
  0x64   : > { %p2127_p12 = pnand %p2126_p9, %p2120_p5 }
  0x66   : > { %2130 = shalt.err (!%p2127_p12)
}
  0x67   : > { %s2826_s27 = smov 4   ;;  %s2827_s30 = smov 64  }
  0x68   : > { %1929 = dma.hbm_to_vmem [thread:$0]  (!%p2429_p13), %s2825_s1, 256, %s365_s25, [#allocation6], %s2827_s30, %s2827_s30, %s2826_s27  }
  0x69   : > { %s2131_s29 = scalar_lea.hbm %s2782_s6, 16 }
  0x6a   : > { %p2132_p4 = scmp.ne.s32.totalorder %s2782_s6, %s2131_s29  ;;  %p2138_p11 = scmp.lt.u32.totalorder %s2131_s29, %s2782_s6 }
  0x6c   : > { %p2134_p8 = pnand %p2132_p4, %p2443_p1 }
  0x6e   : > { %p2135_p10 = pneg %p2134_p8 }
  0x70   : > { %p2140_p0 = pnand %p2138_p11, %p2135_p10 }
  0x72   : > { %2143 = shalt.err (!%p2140_p0)
}
  0x73   : > { %s2144_s20 = scalar_lea.vmem %s401_s14, 16  ;;  %s2151_s25 = scalar_lea.vmem %s401_s14, 32 }
  0x74   : > { %p2145_p2 = scmp.ne.s32.totalorder %s401_s14, %s2144_s20  ;;  %p2152_p6 = scmp.lt.s32.totalorder %s401_s14, %s401_s14 }
  0x75   : > { %p2153_p7 = scmp.lt.s32.totalorder %s2151_s25, %s2144_s20 }
  0x76   : > { %p2147_p3 = pnand %p2145_p2, %p2443_p1 }
  0x77   : > { %p2154_p9 = por %p2153_p7, %p2152_p6 }
  0x78   : > { %p2148_p5 = pneg %p2147_p3 }
  0x7a   : > { %p2155_p12 = pnand %p2154_p9, %p2148_p5 }
  0x7c   : > { %2158 = shalt.err (!%p2155_p12)
}
  0x7d   : > { %1935 = dma.hbm_to_vmem [thread:$0]  (!%p2429_p13), %s2782_s6, 16, %s401_s14, [#allocation9]  }
  0x7e   : > { %s2285_s17 = smov [#allocation13]   ;;  %s2159_s12 = scalar_lea.hbm %s2786_s10, 128 }
  0x7f   : > { %s427_s29 = sshll.u32 %s2285_s17, 4  ;;  %p2160_p4 = scmp.ne.s32.totalorder %s2786_s10, %s2159_s12  ;;  %s428_s29 = int_to_ptr.vmem [resolvable:$true] %s427_s29 }
  0x80   : > { %p2166_p11 = scmp.lt.u32.totalorder %s2159_s12, %s2786_s10 }
  0x81   : > { %p2162_p8 = pnand %p2160_p4, %p2443_p1 }
  0x83   : > { %p2163_p10 = pneg %p2162_p8 }
  0x85   : > { %p2168_p0 = pnand %p2166_p11, %p2163_p10 }
  0x87   : > { %2171 = shalt.err (!%p2168_p0)
}
  0x88   : > { %s2172_s14 = scalar_lea.vmem %s428_s29, 128  ;;  %p2180_p6 = scmp.lt.s32.totalorder %s428_s29, %s428_s29 }
  0x89   : > { %p2173_p2 = scmp.ne.s32.totalorder %s428_s29, %s2172_s14  ;;  %p2181_p7 = scmp.lt.s32.totalorder %s2172_s14, %s2172_s14 }
  0x8b   : > { %p2175_p3 = pnand %p2173_p2, %p2443_p1  ;;  %p2182_p9 = por %p2181_p7, %p2180_p6 }
  0x8d   : > { %p2176_p5 = pneg %p2175_p3 }
  0x8f   : > { %p2183_p12 = pnand %p2182_p9, %p2176_p5 }
  0x91   : > { %2186 = shalt.err (!%p2183_p12)
}
  0x92   : > { %1941 = dma.hbm_to_vmem [thread:$0]  (!%p2429_p13), %s2786_s10, 128, %s428_s29, [#allocation12], %s2827_s30, %s2827_s30, %s2826_s27  }
  0x93   : > { %p2828_p4 = scmp.ne.s32.totalorder %s2821_s22, 0 }
  0x94   : > { %p2829_p1 = scmp.ne.s32.totalorder (!%p2828_p4), %s2822_s23, 0 }
  0x95   : > { %456 = sbr.rel (%p2828_p4) target bundleno = 3228 (0xc9c), region = 72 }
  0x9c   : > { %2240 = dma.done.wait (%p2829_p1), [#allocation6], 256  }
  0x9d   : > { %2242 = vsyncadd (%p2829_p1), [#allocation6], 4294967040 }
  0x9e   : > { %2244 = dma.done.wait (%p2829_p1), [#allocation9], 272  }
  0x9f   : > { %2246 = vsyncadd (%p2829_p1), [#allocation9], 4294967024 }
  0xa0   : > { %2248 = dma.done.wait (%p2829_p1), [#allocation12], 144  }
  0xa1   : > { %2250 = vsyncadd (%p2829_p1), [#allocation12], 4294967152  ;;  %p515_p13 = scmp.lt.s32.totalorder %s2269_s28, 1  ;;  %v2286_v0 = vmov 0.0   ;;  %vm2287_vm0 = vmmov 0   ;;  %v2017_v1 = vld [vmem:[%s2783_s7] sm:$0xff]  }
  0xa2   : > { %1788 = vmatprep.subr.bf16.mxu0 %v2286_v0  ;;  %1792 = vmatprep.mubr.msk.bf16.mxu0 %vm2287_vm0, %v2286_v0  ;;  %v2018_v2 = vld [vmem:[%s2783_s7 + $0x8] sm:$0xff]   ;;  %vm549_vm1 = vcmask 261120   ;;  %v2019_v5 = vld [vmem:[%s2785_s9] sm:$0xff]   ;;  %v2020_v6 = vld [vmem:[#allocation13] sm:$0xff]   ;;  %vm607_vm2 = vcmask 130048   ;;  %vm824_vm3 = vcmask 257024  }
  0xa3   : > { %s516_s22 = scalar_select %p515_p13, %s2269_s28, 1  ;;  %1796 = vmatprep.subr.bf16.mxu1 %v2286_v0  ;;  %1798 = vmatprep.mubr.msk.bf16.mxu1 %vm2287_vm0, %v2286_v0  ;;  %v1709_v7 = vld [vmem:[#allocation11] ss:$0 sm:$0xff]  ;;  %v2021_v14 = vld [vmem:[%s2779_s3] sm:$0xff]   ;;  %v2022_v17 = vld [vmem:[%s2779_s3 + $0x8] sm:$0xff]   ;;  %vm902_vm4 = vcmask 64512  }
  0xa4   : > { %1789 = vmatpush3.bf16.msra.mxu0 %v2017_v1  ;;  %1797 = vmatpush3.bf16.msra.mxu1 %v2019_v5  ;;  %v2025_v16 = vld [vmem:[#allocation5] sm:$0xff]   ;;  %v2026_v18 = vld [vmem:[#allocation5 + $0x8] sm:$0xff]   ;;  %v2023_v19 = vld [vmem:[#allocation8] sm:$0xff]   ;;  %vm964_vm5 = vcmask 1043456   ;;  %s2290_s17 = smov 104   ;;  %s512_s16 = sand.u32 1, %s2261_s26  }
  0xa5   : > { %s1708_s19 = sshll.u32 %s516_s22, 3  ;;  %1790 = vmatprep.subr.bf16.mxu0 %v2286_v0  ;;  %1802 = vmatprep.subr.bf16.mxu1 %v2286_v0  ;;  %v2024_v20 = vld [vmem:[#allocation8 + $0x8] sm:$0xff]   ;;  %v1718_v30 = vld [vmem:[%s2780_s4] ss:$0 sm:$0xff]  ;;  %v1724_v42 = vld [vmem:[#allocation10] ss:$0 sm:$0xff] }
  0xa6   : > { %s518_s27 = scalar_lea.vmem %s2776_s0, %s1708_s19  ;;  %v1725_v45 = vld [vmem:[%s2778_s2] ss:$0 sm:$0xff]  ;;  %s2288_s19 = smov 120  }
  0xa7   : > { %v524_v3 = vld [vmem:[%s518_s27] sm:$0xff]  ;;  %s2289_s27 = smov 112   ;;  %s2830_s20 = sld [smem:[#allocation24_spill]] }
  0xa8   : > { %v525_v4 = vpack.c.bf16 %v524_v3, %v524_v3  ;;  %1791 = vmatpush3.bf16.msra.mxu0 %v2018_v2  ;;  %s1707_s25 = sshll.u32 %s512_s16, 3  ;;  %s2831_s18 = sld [smem:[#allocation28_spill]] }
  0xa9   : > { %1810 = vmatprep.subr.bf16.mxu0 %v2286_v0  ;;  %s1745_s22 = sshll.u32 %s2269_s28, 7  ;;  %s2832_s30 = sld [smem:[#allocation29_spill]] }
  0xaa   : > { %s1558_s29 = scalar_lea.sflag [#allocation7], %s512_s16  ;;  %s2291_s28 = smov [#allocation14]  }
  0xab   : > { %1793 = vmatmul.mubr.msk.bf16.vlgmr.msra.gmra.mrb[0].mxu0 %vm549_vm1, %v525_v4  ;;  %s2191_s13 = sshll.u32 %s2291_s28, 4  ;;  %s2192_s13 = int_to_ptr.vmem [resolvable:$false] %s2191_s13 }
  0xac   : > { %1812 = vmatprep.mubr.msk.bf16.mxu0 %vm2287_vm0, %v2286_v0  ;;  %1811 = vmatpush3.bf16.msra.mxu0 %v2020_v6  ;;  %s2193_s12 = scalar_lea.vmem %s2192_s13, 256 }
  0xad   : > { %1824 = vmatprep.subr.bf16.mxu0 %v2286_v0  ;;  %p2834_p10 = scmp.ne.s32.totalorder %s2830_s20, 0 }
  0xaf   : > { %s2833_s21 = smov %s2832_s30 }
 0x17e   : > { %v587_v8 = vpop.f32.mrb[0].mxu0 }
 0x17f   : > { %v588_v9 = vadd.f32 %v1709_v7, %v587_v8  ;;  %v1794_v10 = vpop.f32.mrb[1].mxu0 }
 0x180   : > { %v590_v11 = vpop.f32.mrb[2].mxu0 }
 0x181   : > { %2029 = vtanh.f32 %v588_v9  ;;  %v1795_v12 = vpop.f32.mrb[3].mxu0  ;;  %v1009_v11 = vld [vmem:[%s2787_s11] sm:$0xf] }
 0x182   : > { %v1014_v12 = vsel %vm964_vm5, %v1009_v11, 0 }
 0x18b   : > { %v2030_v13 = vpop.eup %2029 }
 0x18c   : > { %v594_v15 = vpack.c.bf16 %v2030_v13, %v2030_v13 }
 0x18e   : > { %1799 = vmatmul.mubr.msk.bf16.vlgmr.msra.gmra.mrb[0].mxu1 %vm607_vm2, %v594_v15  ;;  %1813 = vmatmul.mubr.msk.bf16.vlgmr.msra.gmra.mrb[4].mxu0 %vm607_vm2, %v594_v15 }
 0x18f   : > { %1803 = vmatpush3.bf16.msra.mxu1 %v2021_v14  ;;  %1806 = vmatprep.mubr.msk.bf16.mxu1 %vm2287_vm0, %v2286_v0 }
 0x190   : > { %1804 = vmatprep.subr.bf16.mxu1 %v2286_v0  ;;  %1825 = vmatpush3.bf16.msra.mxu0 %v2025_v16 }
 0x191   : > { %1826 = vmatprep.subr.bf16.mxu0 %v2286_v0  ;;  %1828 = vmatprep.mubr.msk.bf16.mxu0 %vm2287_vm0, %v2286_v0 }
 0x193   : > { %1805 = vmatpush3.bf16.msra.mxu1 %v2022_v17 }
 0x194   : > { %1816 = vmatprep.subr.bf16.mxu1 %v2286_v0  ;;  %1827 = vmatpush3.bf16.msra.mxu0 %v2026_v18 }
 0x195   : > { %1838 = vmatprep.subr.bf16.mxu0 %v2286_v0 }
 0x196   : > { %1807 = vmatmul.mubr.msk.bf16.vlgmr.msra.gmra.mrb[4].mxu1 %vm549_vm1, %v525_v4 }
 0x197   : > { %1817 = vmatpush3.bf16.msra.mxu1 %v2023_v19  ;;  %1820 = vmatprep.mubr.msk.bf16.mxu1 %vm2287_vm0, %v2286_v0 }
 0x198   : > { %1818 = vmatprep.subr.bf16.mxu1 %v2286_v0  ;;  %1829 = vmatmul.mubr.msk.bf16.vlgmr.msra.gmra.mrb[8].mxu0 %vm549_vm1, %v525_v4 }
 0x199   : > { %1840 = vmatprep.mubr.msk.bf16.mxu0 %vm2287_vm0, %v2286_v0 }
 0x19b   : > { %1819 = vmatpush3.bf16.msra.mxu1 %v2024_v20 }
 0x19c   : > { %1832 = vmatprep.subr.bf16.mxu1 %v2286_v0 }
 0x19e   : > { %1821 = vmatmul.mubr.msk.bf16.vlgmr.msra.gmra.mrb[8].mxu1 %vm549_vm1, %v525_v4 }
 0x19f   : > { %1834 = vmatprep.mubr.msk.bf16.mxu1 %vm2287_vm0, %v2286_v0 }
 0x261   : > { %v645_v21 = vpop.f32.mrb[0].mxu1  ;;  %v757_v22 = vpop.f32.mrb[4].mxu0 }
 0x262   : > { %v1800_v23 = vpop.f32.mrb[1].mxu1  ;;  %v1814_v24 = vpop.f32.mrb[5].mxu0 }
 0x263   : > { %v648_v25 = vpop.f32.mrb[2].mxu1  ;;  %v760_v26 = vpop.f32.mrb[6].mxu0 }
 0x264   : > { %v1801_v27 = vpop.f32.mrb[3].mxu1  ;;  %v1815_v28 = vpop.f32.mrb[7].mxu0 }
 0x269   : > { %v697_v29 = vpop.f32.mrb[4].mxu1 }
 0x26a   : > { %v698_v31 = vadd.f32 %v697_v29, %v645_v21  ;;  %v1808_v32 = vpop.f32.mrb[5].mxu1 }
 0x26b   : > { %v700_v33 = vpop.f32.mrb[6].mxu1  ;;  %v893_v34 = vpop.f32.mrb[8].mxu0 }
 0x26c   : > { %v710_v35 = vadd.f32 %v1718_v30, %v698_v31  ;;  %v1809_v36 = vpop.f32.mrb[7].mxu1  ;;  %v1830_v37 = vpop.f32.mrb[9].mxu0  ;;  %v894_v50 = vadd.f32 %v1725_v45, %v893_v34  ;;  %v1175_v31 = vld [vmem:[%s2787_s11 + $0x4] sm:$0xf] }
 0x26d   : > { %v896_v38 = vpop.f32.mrb[10].mxu0  ;;  %v1180_v32 = vsel %vm964_vm5, %v1175_v31, 0 }
 0x26e   : > { %v823_v39 = vpack.c.bf16 %v710_v35, %v710_v35  ;;  %v1831_v40 = vpop.f32.mrb[11].mxu0  ;;  %v2623_v54 = vpack.c.bf16 %v894_v50, %v894_v50 }
 0x270   : > { %825 = vst.msk [vmem:[#allocation2] sm:$0xf] %vm824_vm3, %v823_v39 }
 0x271   : > { %v809_v41 = vpop.f32.mrb[8].mxu1 }
 0x272   : > { %v810_v43 = vadd.f32 %v809_v41, %v757_v22  ;;  %v1822_v44 = vpop.f32.mrb[9].mxu1 }
 0x273   : > { %v812_v46 = vpop.f32.mrb[10].mxu1 }
 0x274   : > { %v822_v47 = vadd.f32 %v1724_v42, %v810_v43  ;;  %v1823_v48 = vpop.f32.mrb[11].mxu1 }
 0x276   : > { %v826_v49 = vpack.c.bf16 %v822_v47, %v822_v47 }
 0x277   : > { %v900_v51 = vld [vmem:[#allocation2] sm:$0xf] }
 0x278   : > { %827 = vst.msk [vmem:[#allocation3] sm:$0xf] %vm824_vm3, %v826_v49  ;;  %v907_v52 = vsel %vm902_vm4, %v900_v51, 0  ;;  %v2621_v53 = vcombine.low %v900_v51, %v900_v51 }
 0x279   : > { %1833 = vmatpush3.bf16.xpose.msra.mxu1 %v907_v52 }
 0x27a   : > { %1063 = vrot.lane.b32.xlu1 %v2621_v53, %s2288_s19  ;;  %1844 = vmatprep.subr.bf16.mxu1 %v2286_v0 }
 0x27e   : > { %1058 = vrot.lane.b32.xlu1 %v2623_v54, %s2288_s19 }
 0x27f   : > { %v901_v55 = vld [vmem:[#allocation3] sm:$0xf] }
 0x280   : > { %1835 = vmatmul.mubr.msk.bf16.vlgmr.msra.gmra.mrb[12].mxu1 %vm902_vm4, %v2623_v54  ;;  %v966_v56 = vsel %vm964_vm5, %v901_v55, 0  ;;  %v2655_v23 = vcombine.low %v901_v55, %v901_v55 }
 0x281   : > { %1839 = vmatpush3.bf16.msra.mxu0 %v966_v56  ;;  %1846 = vmatprep.mubr.msk.bf16.mxu1 %vm2287_vm0, %v2286_v0 }
 0x282   : > { %1850 = vmatprep.subr.bf16.mxu0 %v2286_v0  ;;  %1845 = vmatpush3.bf16.msra.mxu1 %v1014_v12 }
 0x283   : > { %1856 = vmatprep.subr.bf16.mxu1 %v2286_v0 }
 0x2ec   : > { %v1064_v7 = vpop.permute.xlu1 %1063 }
 0x2ed   : > { %v1069_v9 = vsel %vm902_vm4, %v1064_v7, 0 }
 0x2f0   : > { %v1059_v10 = vpop.permute.xlu1 %1058 }
 0x353   : > { %v943_v57 = vpop.f32.mrb[12].mxu1 }
 0x354   : > { %v1836_v58 = vpop.f32.mrb[13].mxu1  ;;  %v949_v59 = vsel %vm902_vm4, %v943_v57, -inf }
 0x355   : > { %950 = vmax.xlane.f32.xlu0 %v949_v59  ;;  %v946_v60 = vpop.f32.mrb[14].mxu1 }
 0x356   : > { %v1837_v61 = vpop.f32.mrb[15].mxu1 }
 0x3e2   : > { %v951_v62 = vpop.xlane.xlu0 %950 }
 0x3e3   : > { %v952_v63 = vsub.f32 %v943_v57, %v951_v62 }
 0x3e5   : > { %v953_v1 = vmul.f32 1.442695, %v952_v63 }
 0x3e7   : > { %2031 = vpow2.f32 %v953_v1 }
 0x3f1   : > { %v2032_v2 = vpop.eup %2031 }
 0x3f2   : > { %v955_v3 = vsel %vm902_vm4, %v2032_v2, 0.0 }
 0x3f3   : > { %956 = vadd.xlane.f32.xlu0 %v955_v3 }
 0x480   : > { %v957_v4 = vpop.xlane.xlu0 %956 }
 0x481   : > { %2033 = vrcp.f32 %v957_v4 }
 0x48b   : > { %v2034_v5 = vpop.eup %2033 }
 0x48c   : > { %v959_v6 = vmul.f32 %v2034_v5, %v2032_v2 }
 0x48e   : > { %v960_v8 = vpack.c.bf16 %v959_v6, %v959_v6 }
 0x490   : > { %1841 = vmatmul.mubr.msk.bf16.vlgmr.msra.gmra.mrb[12].mxu0 %vm902_vm4, %v960_v8 }
 0x491   : > { %1851 = vmatpush3.bf16.xpose.msra.mxu0 %v1069_v9  ;;  %1852 = vmatprep.mubr.msk.bf16.mxu0 %vm2287_vm0, %v2286_v0 }
 0x492   : > { %1862 = vmatprep.subr.bf16.mxu0 %v2286_v0 }
 0x498   : > { %1853 = vmatmul.mubr.msk.bf16.vlgmr.msra.gmra.mrb[16].mxu0 %vm902_vm4, %v1059_v10 }
 0x499   : > { %1864 = vmatprep.mubr.msk.bf16.mxu0 %vm2287_vm0, %v2286_v0  ;;  %1863 = vmatpush3.bf16.msra.mxu0 %v1180_v32 }
 0x49a   : > { %1874 = vmatprep.subr.bf16.mxu0 %v2286_v0 }
 0x563   : > { %v1002_v13 = vpop.f32.mrb[12].mxu0 }
 0x564   : > { %v1008_v14 = vpack.c.bf16 %v1002_v13, %v1002_v13  ;;  %v1842_v15 = vpop.f32.mrb[13].mxu0 }
 0x565   : > { %v1005_v16 = vpop.f32.mrb[14].mxu0 }
 0x566   : > { %v1843_v17 = vpop.f32.mrb[15].mxu0  ;;  %1847 = vmatmul.mubr.msk.bf16.vlgmr.msra.gmra.mrb[16].mxu1 %vm902_vm4, %v1008_v14 }
 0x567   : > { %1858 = vmatprep.mubr.msk.bf16.mxu1 %vm2287_vm0, %v2286_v0 }
 0x56b   : > { %v1105_v18 = vpop.f32.mrb[16].mxu0 }
 0x56c   : > { %v1854_v19 = vpop.f32.mrb[17].mxu0  ;;  %v1111_v20 = vsel %vm902_vm4, %v1105_v18, -inf }
 0x56d   : > { %1112 = vmax.xlane.f32.xlu0 %v1111_v20  ;;  %v1108_v21 = vpop.f32.mrb[18].mxu0 }
 0x56e   : > { %v1855_v22 = vpop.f32.mrb[19].mxu0 }
 0x583   : > { %1126 = vrot.lane.b32.xlu0 %v2655_v23, %s2288_s19  ;;  %s514_s19 = scalar_lea.vmem [#allocation14], %s1707_s25 }
 0x584   : > { %s1572_s24 = sshll.u32 %s514_s19, 4  ;;  %s2730_s24 = int_to_ptr.vmem [resolvable:$true] %s1572_s24 }
 0x585   : > { %s2187_s15 = scalar_lea.vmem %s2730_s24, 128  ;;  %p2194_p2 = scmp.lt.s32.totalorder %s2730_s24, %s2192_s13 }
 0x586   : > { %p2188_p8 = scmp.ne.s32.totalorder %s2730_s24, %s2187_s15  ;;  %p2195_p3 = scmp.lt.s32.totalorder %s2193_s12, %s2187_s15 }
 0x587   : > { %1227 = vrot.lane.b32.xlu0 %v2621_v53, %s2289_s27 }
 0x588   : > { %p2189_p11 = pnand %p2188_p8, %p2834_p10  ;;  %p2196_p5 = por %p2195_p3, %p2194_p2 }
 0x58a   : > { %p2190_p0 = pneg %p2189_p11 }
 0x58b   : > { %1225 = vrot.lane.b32.xlu0 %v2623_v54, %s2289_s27 }
 0x58c   : > { %p2197_p6 = pnand %p2196_p5, %p2190_p0 }
 0x5fa   : > { %v1113_v24 = vpop.xlane.xlu0 %1112 }
 0x5fb   : > { %v1114_v25 = vsub.f32 %v1105_v18, %v1113_v24 }
 0x5fd   : > { %v1115_v26 = vmul.f32 1.442695, %v1114_v25 }
 0x5fe   : > { %v1127_v27 = vpop.permute.xlu0 %1126 }
 0x5ff   : > { %2035 = vpow2.f32 %v1115_v26  ;;  %v1132_v28 = vsel %vm964_vm5, %v1127_v27, 0 }
 0x600   : > { %1857 = vmatpush3.bf16.msra.mxu1 %v1132_v28 }
 0x601   : > { %1868 = vmatprep.subr.bf16.mxu1 %v2286_v0 }
 0x602   : > { %v1228_v40 = vpop.permute.xlu0 %1227 }
 0x603   : > { %v1233_v42 = vsel %vm902_vm4, %v1228_v40, 0 }
 0x606   : > { %v1226_v43 = vpop.permute.xlu0 %1225 }
 0x609   : > { %v2036_v29 = vpop.eup %2035 }
 0x60a   : > { %v1117_v30 = vsel %vm902_vm4, %v2036_v29, 0.0 }
 0x60b   : > { %1118 = vadd.xlane.f32.xlu1 %v1117_v30  ;;  %v1497_v30 = vld [vmem:[%s2787_s11 + $0xc] sm:$0xf] }
 0x60c   : > { %v1502_v31 = vsel %vm964_vm5, %v1497_v30, 0 }
 0x61c   : > { %1287 = vrot.lane.b32.xlu1 %v2655_v23, %s2289_s27 }
 0x639   : > { %v1050_v33 = vpop.f32.mrb[16].mxu1 }
 0x63a   : > { %1056 = vst.msk [vmem:[#allocation4] sm:$0xff] %vm549_vm1, %v1050_v33  ;;  %v1848_v34 = vpop.f32.mrb[17].mxu1 }
 0x63b   : > { %v1053_v35 = vpop.f32.mrb[18].mxu1 }
 0x63c   : > { %v1849_v36 = vpop.f32.mrb[19].mxu1 }
 0x641   : > { %v1222_v1 = vld [vmem:[#allocation4] sm:$0xff] }
 0x698   : > { %v1119_v37 = vpop.xlane.xlu1 %1118 }
 0x699   : > { %2037 = vrcp.f32 %v1119_v37 }
 0x69c   : > { %v1288_v44 = vpop.permute.xlu1 %1287 }
 0x69d   : > { %v1293_v49 = vsel %vm964_vm5, %v1288_v44, 0 }
 0x6a3   : > { %v2038_v38 = vpop.eup %2037 }
 0x6a4   : > { %v1121_v39 = vmul.f32 %v2038_v38, %v2036_v29 }
 0x6a6   : > { %v1122_v41 = vpack.c.bf16 %v1121_v39, %v1121_v39 }
 0x6a8   : > { %1859 = vmatmul.mubr.msk.bf16.vlgmr.msra.gmra.mrb[20].mxu1 %vm902_vm4, %v1122_v41 }
 0x6a9   : > { %1869 = vmatpush3.bf16.xpose.msra.mxu1 %v1233_v42  ;;  %1870 = vmatprep.mubr.msk.bf16.mxu1 %vm2287_vm0, %v2286_v0 }
 0x6aa   : > { %1880 = vmatprep.subr.bf16.mxu1 %v2286_v0 }
 0x6b0   : > { %1871 = vmatmul.mubr.msk.bf16.vlgmr.msra.gmra.mrb[24].mxu1 %vm902_vm4, %v1226_v43 }
 0x6b1   : > { %1882 = vmatprep.mubr.msk.bf16.mxu1 %vm2287_vm0, %v2286_v0 }
 0x77b   : > { %v1168_v45 = vpop.f32.mrb[20].mxu1 }
 0x77c   : > { %v1174_v46 = vpack.c.bf16 %v1168_v45, %v1168_v45  ;;  %v1860_v47 = vpop.f32.mrb[21].mxu1 }
 0x77d   : > { %v1171_v48 = vpop.f32.mrb[22].mxu1 }
 0x77e   : > { %v1861_v50 = vpop.f32.mrb[23].mxu1  ;;  %1865 = vmatmul.mubr.msk.bf16.vlgmr.msra.gmra.mrb[20].mxu0 %vm902_vm4, %v1174_v46 }
 0x77f   : > { %1875 = vmatpush3.bf16.msra.mxu0 %v1293_v49  ;;  %1876 = vmatprep.mubr.msk.bf16.mxu0 %vm2287_vm0, %v2286_v0 }
 0x780   : > { %1886 = vmatprep.subr.bf16.mxu0 %v2286_v0 }
 0x783   : > { %v1269_v51 = vpop.f32.mrb[24].mxu1 }
 0x784   : > { %v1872_v52 = vpop.f32.mrb[25].mxu1  ;;  %v1275_v55 = vsel %vm902_vm4, %v1269_v51, -inf }
 0x785   : > { %1276 = vmax.xlane.f32.xlu0 %v1275_v55  ;;  %v1272_v56 = vpop.f32.mrb[26].mxu1  ;;  %v1743_v52 = vld [vmem:[%s2831_s18] ss:$0 sm:$0xff] }
 0x786   : > { %v1873_v57 = vpop.f32.mrb[27].mxu1 }
 0x812   : > { %v1277_v58 = vpop.xlane.xlu0 %1276 }
 0x813   : > { %v1278_v59 = vsub.f32 %v1269_v51, %v1277_v58 }
 0x815   : > { %v1279_v60 = vmul.f32 1.442695, %v1278_v59 }
 0x817   : > { %2039 = vpow2.f32 %v1279_v60 }
 0x821   : > { %v2040_v61 = vpop.eup %2039 }
 0x822   : > { %v1281_v62 = vsel %vm902_vm4, %v2040_v61, 0.0 }
 0x823   : > { %1282 = vadd.xlane.f32.xlu1 %v1281_v62 }
 0x834   : > { %1388 = vrot.lane.b32.xlu1 %v2621_v53, %s2290_s17 }
 0x838   : > { %1386 = vrot.lane.b32.xlu1 %v2623_v54, %s2290_s17  ;;  %v1336_v54 = vld [vmem:[%s2787_s11 + $0x8] sm:$0xf] }
 0x839   : > { %v1341_v12 = vsel %vm964_vm5, %v1336_v54, 0 }
 0x83a   : > { %1881 = vmatpush3.bf16.msra.mxu1 %v1341_v12 }
 0x83b   : > { %1892 = vmatprep.subr.bf16.mxu1 %v2286_v0 }
 0x851   : > { %v1216_v63 = vpop.f32.mrb[20].mxu0 }
 0x852   : > { %v1223_v2 = vadd.f32 %v1222_v1, %v1216_v63  ;;  %v1866_v3 = vpop.f32.mrb[21].mxu0 }
 0x853   : > { %v1219_v4 = vpop.f32.mrb[22].mxu0 }
 0x854   : > { %1224 = vst.msk [vmem:[#allocation4] sm:$0xff] %vm549_vm1, %v1223_v2  ;;  %v1867_v5 = vpop.f32.mrb[23].mxu0 }
 0x85b   : > { %v1383_v32 = vld [vmem:[#allocation4] sm:$0xff] }
 0x8b0   : > { %v1283_v6 = vpop.xlane.xlu1 %1282 }
 0x8b1   : > { %2041 = vrcp.f32 %v1283_v6 }
 0x8b4   : > { %v1389_v9 = vpop.permute.xlu1 %1388 }
 0x8b5   : > { %v1394_v11 = vsel %vm902_vm4, %v1389_v9, 0 }
 0x8b8   : > { %v1387_v53 = vpop.permute.xlu1 %1386 }
 0x8bb   : > { %v2042_v7 = vpop.eup %2041 }
 0x8bc   : > { %v1285_v8 = vmul.f32 %v2042_v7, %v2040_v61 }
 0x8be   : > { %v1286_v10 = vpack.c.bf16 %v1285_v8, %v1285_v8 }
 0x8c0   : > { %1877 = vmatmul.mubr.msk.bf16.vlgmr.msra.gmra.mrb[24].mxu0 %vm902_vm4, %v1286_v10 }
 0x8c1   : > { %1887 = vmatpush3.bf16.xpose.msra.mxu0 %v1394_v11  ;;  %1888 = vmatprep.mubr.msk.bf16.mxu0 %vm2287_vm0, %v2286_v0 }
 0x8c2   : > { %1898 = vmatprep.subr.bf16.mxu0 %v2286_v0 }
 0x8c8   : > { %1889 = vmatmul.mubr.msk.bf16.vlgmr.msra.gmra.mrb[28].mxu0 %vm902_vm4, %v1387_v53 }
 0x8c9   : > { %1900 = vmatprep.mubr.msk.bf16.mxu0 %vm2287_vm0, %v2286_v0  ;;  %1899 = vmatpush3.bf16.msra.mxu0 %v1502_v31 }
 0x993   : > { %v1329_v13 = vpop.f32.mrb[24].mxu0 }
 0x994   : > { %v1335_v14 = vpack.c.bf16 %v1329_v13, %v1329_v13  ;;  %v1878_v15 = vpop.f32.mrb[25].mxu0 }
 0x995   : > { %v1332_v16 = vpop.f32.mrb[26].mxu0 }
 0x996   : > { %v1879_v17 = vpop.f32.mrb[27].mxu0  ;;  %1883 = vmatmul.mubr.msk.bf16.vlgmr.msra.gmra.mrb[28].mxu1 %vm902_vm4, %v1335_v14 }
 0x997   : > { %1894 = vmatprep.mubr.msk.bf16.mxu1 %vm2287_vm0, %v2286_v0 }
 0x99b   : > { %v1430_v18 = vpop.f32.mrb[28].mxu0 }
 0x99c   : > { %v1890_v19 = vpop.f32.mrb[29].mxu0  ;;  %v1436_v20 = vsel %vm902_vm4, %v1430_v18, -inf }
 0x99d   : > { %1437 = vmax.xlane.f32.xlu0 %v1436_v20  ;;  %v1433_v21 = vpop.f32.mrb[30].mxu0 }
 0x99e   : > { %v1891_v22 = vpop.f32.mrb[31].mxu0 }
 0x9b3   : > { %1448 = vrot.lane.b32.xlu0 %v2655_v23, %s2290_s17  ;;  %s2728_s17 = scalar_lea.hbm %s2832_s30, %s1745_s22 }
 0xa2a   : > { %v1438_v24 = vpop.xlane.xlu0 %1437 }
 0xa2b   : > { %v1439_v25 = vsub.f32 %v1430_v18, %v1438_v24 }
 0xa2d   : > { %v1440_v26 = vmul.f32 1.442695, %v1439_v25 }
 0xa2e   : > { %v1449_v27 = vpop.permute.xlu0 %1448 }
 0xa2f   : > { %2043 = vpow2.f32 %v1440_v26  ;;  %v1454_v28 = vsel %vm964_vm5, %v1449_v27, 0 }
 0xa30   : > { %1893 = vmatpush3.bf16.msra.mxu1 %v1454_v28 }
 0xa39   : > { %v2044_v29 = vpop.eup %2043 }
 0xa3a   : > { %v1442_v0 = vsel %vm902_vm4, %v2044_v29, 0.0 }
 0xa3b   : > { %1443 = vadd.xlane.f32.xlu1 %v1442_v0 }
 0xa69   : > { %v1377_v23 = vpop.f32.mrb[28].mxu1 }
 0xa6a   : > { %v1384_v33 = vadd.f32 %v1383_v32, %v1377_v23  ;;  %v1884_v34 = vpop.f32.mrb[29].mxu1 }
 0xa6b   : > { %v1380_v35 = vpop.f32.mrb[30].mxu1 }
 0xa6c   : > { %1385 = vst.msk [vmem:[#allocation4] sm:$0xff] %vm549_vm1, %v1384_v33  ;;  %v1885_v36 = vpop.f32.mrb[31].mxu1 }
 0xa73   : > { %v1544_v47 = vld [vmem:[#allocation4] sm:$0xff] }
 0xac8   : > { %v1444_v37 = vpop.xlane.xlu1 %1443 }
 0xac9   : > { %2045 = vrcp.f32 %v1444_v37 }
 0xad3   : > { %v2046_v38 = vpop.eup %2045 }
 0xad4   : > { %v1446_v39 = vmul.f32 %v2046_v38, %v2044_v29 }
 0xad6   : > { %v1447_v40 = vpack.c.bf16 %v1446_v39, %v1446_v39 }
 0xad8   : > { %1895 = vmatmul.mubr.msk.bf16.vlgmr.msra.gmra.mrb[32].mxu1 %vm902_vm4, %v1447_v40 }
 0xbab   : > { %v1490_v41 = vpop.f32.mrb[32].mxu1 }
 0xbac   : > { %v1496_v42 = vpack.c.bf16 %v1490_v41, %v1490_v41  ;;  %v1896_v43 = vpop.f32.mrb[33].mxu1 }
 0xbad   : > { %v1493_v44 = vpop.f32.mrb[34].mxu1 }
 0xbae   : > { %v1897_v45 = vpop.f32.mrb[35].mxu1  ;;  %1901 = vmatmul.mubr.msk.bf16.vlgmr.msra.gmra.mrb[32].mxu0 %vm902_vm4, %v1496_v42 }
 0xc81   : > { %v1538_v46 = vpop.f32.mrb[32].mxu0 }
 0xc82   : > { %v1545_v48 = vadd.f32 %v1544_v47, %v1538_v46  ;;  %v1902_v49 = vpop.f32.mrb[33].mxu0 }
 0xc83   : > { %v1541_v50 = vpop.f32.mrb[34].mxu0 }
 0xc84   : > { %1546 = vst.msk [vmem:[#allocation4] sm:$0xff] %vm549_vm1, %v1545_v48  ;;  %v1903_v51 = vpop.f32.mrb[35].mxu0 }
 0xc8b   : > { %v1547_v55 = vld [vmem:[#allocation4] sm:$0xff] }
 0xc8c   : > { %v1555_v56 = vadd.f32 %v1743_v52, %v1547_v55 }
 0xc8e   : > { %1556 = vst.msk [vmem:[%s514_s19] sm:$0xff] %vm549_vm1, %v1555_v56 }
 0xc8f   : > { %2200 = shalt.err (!%p2197_p6)
}
 0xc90   : > { %s2201_s16 = scalar_lea.hbm %s2728_s17, 128  ;;  %s2205_s1 = scalar_lea.hbm %s2833_s21, 256 }
 0xc91   : > { %p2202_p7 = scmp.ne.s32.totalorder %s2728_s17, %s2201_s16  ;;  %p2206_p4 = scmp.lt.u32.totalorder %s2728_s17, %s2833_s21 }
 0xc92   : > { %p2207_p1 = scmp.lt.u32.totalorder %s2205_s1, %s2201_s16  ;;  %p2209_p8 = scmp.lt.u32.totalorder %s2201_s16, %s2728_s17 }
 0xc93   : > { %p2203_p9 = pnand %p2202_p7, %p2834_p10 }
 0xc94   : > { %p2208_p13 = por %p2207_p1, %p2206_p4 }
 0xc95   : > { %p2204_p12 = pneg %p2203_p9 }
 0xc96   : > { %p2210_p11 = por %p2209_p8, %p2208_p13 }
 0xc98   : > { %p2211_p0 = pnand %p2210_p11, %p2204_p12 }
 0xc9a   : > { %2214 = shalt.err (!%p2211_p0)
}
 0xc9b   : > { %1924 = dma.vmem_to_hbm [thread:$0]  (%p2834_p10), %s2730_s24, 128, %s2728_s17, %s1558_s29  }
 0xc9c PF: > { %s2835_s19 = sld [smem:[#allocation22_spill]]  ;;  %s2836_s23 = sld [smem:[#allocation19_spill]] }
 0xc9d   : > { %s2837_s27 = sld [smem:[#allocation25_spill]] }
 0xca2   : > { %p1956_p2 = scmp.ge.s32.totalorder %s2835_s19, 2  ;;  %s1584_s30 = sand.u32 1, %s2836_s23  }
 0xca3   : > { %p2838_p3 = scmp.ne.s32.totalorder %s2837_s27, 0  ;;  %s1585_s15 = scalar_lea.sflag [#allocation7], %s1584_s30 }
 0xca5   : > { %p1943_p5 = pnand %p1956_p2, %p2838_p3 }
 0xca7   : > { %2252 = dma.done.wait (!%p1943_p5), %s1585_s15, 128  }
 0xca8   : > { %2254 = vsyncadd (!%p1943_p5), %s1585_s15, 4294967168  ;;  %s29_s30 = sadd.s32 1, %s2835_s19   ;;  %s2839_s28 = sld [smem:[#allocation20_spill]] }
 0xca9   : > { %p26_p6 = scmp.ge.s32.totalorder %s29_s30, 4   ;;  %s2840_s27 = sld [smem:[#allocation26_spill]] }
 0xcaa   : > { %s2841_s20 = sld [smem:[#allocation21_spill]]  ;;  %s2842_s29 = sld [smem:[#allocation23_spill]] }
 0xcab   : > { %s2843_s25 = smov %s2261_s26  ;;  %28 = sbr.rel (!%p26_p6) target bundleno = 11 (0xb), region = 133 }
 0xcae   : > { %s2844_s26 = smov %s2839_s28 }
 0xcb0   : > { %s2845_s28 = smov %s2841_s20 }
 0xcb2   :  { %1590 = vsyncpa [#allocation6], 1 }
 0xcb3   :  { %1592 = vsyncpa [#allocation6 + $0x1], 1 }
 0xcb4   :  { %1593 = vsyncpa [#allocation9], 1 }
 0xcb5   :  { %1594 = vsyncpa [#allocation12], 1 }
 0xcb6   :  { %1595 = vsyncpa [#allocation7], 1 }
 0xcb7   :  { %1597 = vsyncpa [#allocation7 + $0x1], 1 }

</bundles_post_ra>
